<compile_context>
chip_gen: v5e
topology: v5e:2x2
jax: 0.10.0
libtpu: 0.0.40
codegen_flags: <defaults>
</compile_context>

<pallas_src>
import math
import jax
import jax.numpy as jnp
from jax.experimental import pallas as pl
from jax.experimental.pallas import tpu as pltpu


def _round_up(x: int, m: int) -> int:
    return ((x + m - 1) // m) * m


def _ffn_kernel(x_ref, w1_ref, b1_ref, w2_ref, b2_ref, o_ref, acc_ref):
    # x_ref : (tm, d_model)  bf16      w1_ref: (d_model, tk) bf16
    # b1_ref: (1, tk)        f32       w2_ref: (tk, d_model) bf16
    # b2_ref: (1, d_model)   f32       o_ref : (tm, d_model) out dtype
    # acc_ref: (tm, d_model) f32 scratch accumulator (persists over dff axis)
    k = pl.program_id(1)

    @pl.when(k == 0)
    def _init():
        acc_ref[...] = jnp.zeros_like(acc_ref)

    # First matmul (MXU, bf16 x bf16 -> f32) + bias + ReLU, per dff chunk.
    h = jnp.dot(x_ref[...], w1_ref[...], preferred_element_type=jnp.float32)
    h = jnp.maximum(h + b1_ref[...], 0.0)

    # Second matmul on this dff chunk, accumulated in f32 scratch.
    acc_ref[...] += jnp.dot(h.astype(w2_ref.dtype), w2_ref[...],
                            preferred_element_type=jnp.float32)

    @pl.when(k == pl.num_programs(1) - 1)
    def _finalize():
        o_ref[...] = (acc_ref[...] + b2_ref[...]).astype(o_ref.dtype)


def ffn_layer(x, w1, b1, w2, b2, *, tm=None, tk=None):
    """Applies Linear(d_model->dff) -> ReLU -> Linear(dff->d_model).

    x: (..., d_model); w1: (d_model, dff); b1: (dff,);
    w2: (dff, d_model); b2: (d_model,).
    """
    orig_shape = x.shape
    orig_dtype = x.dtype
    d_model = orig_shape[-1]
    dff = w1.shape[1]

    x2d = x.reshape(-1, d_model)
    M = x2d.shape[0]

    # Row tile: MXU-friendly 256 for large M; tiny M rounded up to sublane (8).
    if tm is None:
        tm = min(256, _round_up(M, 8))
    tm = _round_up(tm, 8)

    # dff chunk: lane multiple of 128, capped so resident weight slices stay
    # small (two (d_model x tk) bf16 slices, double-buffered).
    if tk is None:
        tk = min(_round_up(dff, 128), 512)
    tk = _round_up(tk, 128)

    M_pad = _round_up(M, tm)
    dff_pad = _round_up(dff, tk)

    # Cast matmul operands to bf16 (MXU-native); keep biases in f32.
    x2d = x2d.astype(jnp.bfloat16)
    w1c = w1.astype(jnp.bfloat16)
    w2c = w2.astype(jnp.bfloat16)
    b1c = b1.reshape(1, dff).astype(jnp.float32)
    b2c = b2.reshape(1, d_model).astype(jnp.float32)

    # Zero-pad so fixed tiles divide evenly. Zero b1 / zero W2 rows in the
    # padded dff region => ReLU(0) = 0 contributes nothing to the output.
    if M_pad != M:
        x2d = jnp.pad(x2d, ((0, M_pad - M), (0, 0)))
    if dff_pad != dff:
        w1c = jnp.pad(w1c, ((0, 0), (0, dff_pad - dff)))
        w2c = jnp.pad(w2c, ((0, dff_pad - dff), (0, 0)))
        b1c = jnp.pad(b1c, ((0, 0), (0, dff_pad - dff)))

    grid = (M_pad // tm, dff_pad // tk)

    out_itemsize = jnp.zeros((), orig_dtype).dtype.itemsize
    cost = pl.CostEstimate(
        flops=2 * 2 * M * d_model * dff,          # two matmuls
        transcendentals=0,
        bytes_accessed=(x2d.size * 2 + w1c.size * 2 + w2c.size * 2
                        + b1c.size * 4 + b2c.size * 4
                        + M * d_model * out_itemsize),
    )

    out2d = pl.pallas_call(
        _ffn_kernel,
        out_shape=jax.ShapeDtypeStruct((M_pad, d_model), orig_dtype),
        grid_spec=pltpu.PrefetchScalarGridSpec(
            num_scalar_prefetch=0,
            grid=grid,
            in_specs=[
                pl.BlockSpec((tm, d_model), lambda i, k: (i, 0)),   # x rows
                pl.BlockSpec((d_model, tk), lambda i, k: (0, k)),   # W1 chunk
                pl.BlockSpec((1, tk), lambda i, k: (0, k)),         # b1 chunk
                pl.BlockSpec((tk, d_model), lambda i, k: (k, 0)),   # W2 chunk
                pl.BlockSpec((1, d_model), lambda i, k: (0, 0)),    # b2
            ],
            out_specs=pl.BlockSpec((tm, d_model), lambda i, k: (i, 0)),
            scratch_shapes=[pltpu.VMEM((tm, d_model), jnp.float32)],
        ),
        compiler_params=pltpu.CompilerParams(
            dimension_semantics=("parallel", "arbitrary"),
            vmem_limit_bytes=64 * 1024 * 1024,
        ),
        cost_estimate=cost,
    )(x2d, w1c, b1c, w2c, b2c)

    return out2d[:M].reshape(orig_shape)


def init_ffn_params(key, d_model, dff, dtype=jnp.float32):
    """Deterministic init mimicking torch.nn.Linear defaults."""
    k1, k2, k3, k4 = jax.random.split(key, 4)
    bound1 = 1.0 / math.sqrt(d_model)
    bound2 = 1.0 / math.sqrt(dff)
    # stored as (in_features, out_features)
    w1 = jax.random.uniform(k1, (d_model, dff), dtype, -bound1, bound1)
    b1 = jax.random.uniform(k2, (dff,), dtype, -bound1, bound1)
    w2 = jax.random.uniform(k3, (dff, d_model), dtype, -bound2, bound2)
    b2 = jax.random.uniform(k4, (d_model,), dtype, -bound2, bound2)
    return w1, b1, w2, b2


if __name__ == "__main__":
    d_model, dff = 128, 512
    batch, seq = 2, 8

    key = jax.random.PRNGKey(0)
    kx, kp = jax.random.split(key)
    x = jax.random.normal(kx, (batch, seq, d_model), jnp.float32)
    w1, b1, w2, b2 = init_ffn_params(kp, d_model, dff)

    out = ffn_layer(x, w1, b1, w2, b2)
    out = jax.block_until_ready(out)
    assert out.shape == x.shape

    # Reference mimicking the kernel's bf16-matmul / f32-accumulate path.
    rt = lambda a: a.astype(jnp.bfloat16).astype(jnp.float32)  # bf16 round-trip
    h_ref = jnp.maximum(rt(x) @ rt(w1) + b1, 0.0)
    ref = rt(h_ref) @ rt(w2) + b2
    assert jnp.allclose(out, ref, atol=2e-2, rtol=2e-2), (
        "max abs err = %f" % float(jnp.max(jnp.abs(out - ref))))

    print("KERNEL_OK")
</pallas_src>

<mosaic_0001>
module attributes {stable_mosaic.version = 11 : i64} {
  func.func @_ffn_kernel(%arg0: i32, %arg1: i32, %arg2: memref<16x128xbf16, #tpu.memory_space<vmem>>, %arg3: memref<128x512xbf16, #tpu.memory_space<vmem>>, %arg4: memref<1x512xf32, #tpu.memory_space<vmem>>, %arg5: memref<512x128xbf16, #tpu.memory_space<vmem>>, %arg6: memref<1x128xf32, #tpu.memory_space<vmem>>, %arg7: memref<16x128xf32, #tpu.memory_space<vmem>>, %arg8: memref<16x128xf32, #tpu.memory_space<vmem>>) attributes {dimension_semantics = [#tpu.dimension_semantics<parallel>, #tpu.dimension_semantics<arbitrary>], iteration_bounds = array<i64: 1, 1>, scalar_prefetch = 0 : i64, scratch_operands = 1 : i64, tpu.core_type = #tpu.core_type<tc>, window_params = [{transform_indices = @transform_0, window_bounds = array<i64: 16, 128>}, {transform_indices = @transform_1, window_bounds = array<i64: 128, 512>}, {transform_indices = @transform_2, window_bounds = array<i64: 1, 512>}, {transform_indices = @transform_3, window_bounds = array<i64: 512, 128>}, {pipeline_mode = #tpu.pipeline_mode<synchronous>, transform_indices = @transform_4, window_bounds = array<i64: 1, 128>}, {transform_indices = @transform_5, window_bounds = array<i64: 16, 128>}]} {
    %c0_i32 = arith.constant 0 : i32
    %0 = arith.cmpi eq, %arg1, %c0_i32 : i32
    %1 = arith.extui %0 : i1 to i32
    %c0_i32_0 = arith.constant 0 : i32
    %2 = arith.cmpi ne, %1, %c0_i32_0 : i32
    scf.if %2 {
      %cst_16 = arith.constant 0.000000e+00 : f32
      %20 = vector.broadcast %cst_16 : f32 to vector<16x128xf32>
      %c0_17 = arith.constant 0 : index
      %c0_18 = arith.constant 0 : index
      %21 = vector.load %arg8[%c0_17, %c0_18] : memref<16x128xf32, #tpu.memory_space<vmem>>, vector<16x128xf32>
      tpu.vector_store %arg8[%c0_17, %c0_18], %20 {strides = array<i32>} : memref<16x128xf32, #tpu.memory_space<vmem>>, vector<16x128xf32>,
    } else {
    }
    %c0 = arith.constant 0 : index
    %c0_1 = arith.constant 0 : index
    %3 = vector.load %arg2[%c0, %c0_1] : memref<16x128xbf16, #tpu.memory_space<vmem>>, vector<16x128xbf16>
    %c0_2 = arith.constant 0 : index
    %c0_3 = arith.constant 0 : index
    %4 = vector.load %arg3[%c0_2, %c0_3] : memref<128x512xbf16, #tpu.memory_space<vmem>>, vector<128x512xbf16>
    %cst = arith.constant dense<0.000000e+00> : vector<16x512xf32>
    %5 = tpu.matmul %3, %4, %cst {dimension_numbers = #tpu.dot_dimension_numbers<[1], [0], [0], [1], [0, 0, 1, 1], [], []>} : vector<16x128xbf16>, vector<128x512xbf16>, vector<16x512xf32> -> vector<16x512xf32>
    %c0_4 = arith.constant 0 : index
    %c0_5 = arith.constant 0 : index
    %6 = vector.load %arg4[%c0_4, %c0_5] : memref<1x512xf32, #tpu.memory_space<vmem>>, vector<1x512xf32>
    %7 = vector.broadcast %6 : vector<1x512xf32> to vector<16x512xf32>
    %8 = arith.addf %5, %7 : vector<16x512xf32>
    %cst_6 = arith.constant 0.000000e+00 : f32
    %9 = vector.broadcast %cst_6 : f32 to vector<16x512xf32>
    %10 = arith.maximumf %8, %9 : vector<16x512xf32>
    %c0_7 = arith.constant 0 : index
    %c0_8 = arith.constant 0 : index
    %11 = vector.load %arg8[%c0_7, %c0_8] : memref<16x128xf32, #tpu.memory_space<vmem>>, vector<16x128xf32>
    %12 = arith.truncf %10 : vector<16x512xf32> to vector<16x512xbf16>
    %c0_9 = arith.constant 0 : index
    %c0_10 = arith.constant 0 : index
    %13 = vector.load %arg5[%c0_9, %c0_10] : memref<512x128xbf16, #tpu.memory_space<vmem>>, vector<512x128xbf16>
    %cst_11 = arith.constant dense<0.000000e+00> : vector<16x128xf32>
    %14 = tpu.matmul %12, %13, %cst_11 {dimension_numbers = #tpu.dot_dimension_numbers<[1], [0], [0], [1], [0, 0, 1, 1], [], []>} : vector<16x512xbf16>, vector<512x128xbf16>, vector<16x128xf32> -> vector<16x128xf32>
    %15 = arith.addf %11, %14 : vector<16x128xf32>
    %c0_12 = arith.constant 0 : index
    %c0_13 = arith.constant 0 : index
    %16 = vector.load %arg8[%c0_12, %c0_13] : memref<16x128xf32, #tpu.memory_space<vmem>>, vector<16x128xf32>
    tpu.vector_store %arg8[%c0_12, %c0_13], %15 {strides = array<i32>} : memref<16x128xf32, #tpu.memory_space<vmem>>, vector<16x128xf32>,
    %c0_i32_14 = arith.constant 0 : i32
    %17 = arith.cmpi eq, %arg1, %c0_i32_14 : i32
    %18 = arith.extui %17 : i1 to i32
    %c0_i32_15 = arith.constant 0 : i32
    %19 = arith.cmpi ne, %18, %c0_i32_15 : i32
    scf.if %19 {
      %c0_16 = arith.constant 0 : index
      %c0_17 = arith.constant 0 : index
      %20 = vector.load %arg8[%c0_16, %c0_17] : memref<16x128xf32, #tpu.memory_space<vmem>>, vector<16x128xf32>
      %c0_18 = arith.constant 0 : index
      %c0_19 = arith.constant 0 : index
      %21 = vector.load %arg6[%c0_18, %c0_19] : memref<1x128xf32, #tpu.memory_space<vmem>>, vector<1x128xf32>
      %22 = vector.broadcast %21 : vector<1x128xf32> to vector<16x128xf32>
      %23 = arith.addf %20, %22 : vector<16x128xf32>
      %c0_20 = arith.constant 0 : index
      %c0_21 = arith.constant 0 : index
      %24 = vector.load %arg7[%c0_20, %c0_21] : memref<16x128xf32, #tpu.memory_space<vmem>>, vector<16x128xf32>
      tpu.vector_store %arg7[%c0_20, %c0_21], %23 {strides = array<i32>} : memref<16x128xf32, #tpu.memory_space<vmem>>, vector<16x128xf32>,
    } else {
    }
    return
  }
  func.func @transform_0(%arg0: i32, %arg1: i32) -> (i32, i32) {
    %c0_i32 = arith.constant 0 : i32
    %c0_i32_0 = arith.constant 0 : i32
    return %arg0, %c0_i32 : i32, i32
  }
  func.func @transform_1(%arg0: i32, %arg1: i32) -> (i32, i32) {
    %c0_i32 = arith.constant 0 : i32
    %c0_i32_0 = arith.constant 0 : i32
    return %c0_i32, %arg1 : i32, i32
  }
  func.func @transform_2(%arg0: i32, %arg1: i32) -> (i32, i32) {
    %c0_i32 = arith.constant 0 : i32
    %c0_i32_0 = arith.constant 0 : i32
    return %c0_i32, %arg1 : i32, i32
  }
  func.func @transform_3(%arg0: i32, %arg1: i32) -> (i32, i32) {
    %c0_i32 = arith.constant 0 : i32
    %c0_i32_0 = arith.constant 0 : i32
    return %arg1, %c0_i32 : i32, i32
  }
  func.func @transform_4(%arg0: i32, %arg1: i32) -> (i32, i32) {
    %c0_i32 = arith.constant 0 : i32
    %c0_i32_0 = arith.constant 0 : i32
    %c0_i32_1 = arith.constant 0 : i32
    return %c0_i32, %c0_i32_0 : i32, i32
  }
  func.func @transform_5(%arg0: i32, %arg1: i32) -> (i32, i32) {
    %c0_i32 = arith.constant 0 : i32
    %c0_i32_0 = arith.constant 0 : i32
    return %arg0, %c0_i32 : i32, i32
  }
}

</mosaic_0001>

<bundles_post_ra>
// kernel: tpu_custom_call.1
= control target key start
LH: loop header
LB: loop body
LE: loop exit
PB: predicated region body
PF: predicated region fallthrough
CT: control target
= control target key end

     0   :  { %10 = vsyncpa [#allocation4], 0  ;;  %s1242_s0 = inlined_call_operand.hbm [shape: bf16[16,128], index: 0, kind: input, shape index: {}]   ;;  %s1243_s1 = inlined_call_operand.hbm [shape: bf16[128,512], index: 1, kind: input, shape index: {}]   ;;  %s1244_s2 = inlined_call_operand.hbm [shape: f32[1,512], index: 2, kind: input, shape index: {}]   ;;  %s1245_s3 = inlined_call_operand.hbm [shape: bf16[512,128], index: 3, kind: input, shape index: {}]   ;;  %s1246_s4 = inlined_call_operand.vmem [shape: f32[1,128], index: 4, kind: input, shape index: {}]   ;;  %s1247_s5 = inlined_call_operand.hbm [shape: f32[16,128], index: 5, kind: output, shape index: {}]  }
   0x1   :  { %11 = vsyncpa [#allocation7], 0 }
   0x2   :  { %12 = vsyncpa [#allocation10], 0  ;;  %s31_s20 = sshll.u32 %s1243_s1, 4  ;;  %s32_s20 = int_to_ptr.hbm [resolvable:$true] %s31_s20 }
   0x3   :  { %13 = vsyncpa [#allocation5], 0  ;;  %s1183_s21 = smov [#allocation6]   ;;  %s18_s25 = sshll.u32 %s1242_s0, 4  ;;  %s19_s25 = int_to_ptr.hbm [resolvable:$true] %s18_s25 }
   0x4   :  { %s33_s22 = sshll.u32 %s1183_s21, 4  ;;  %s1184_s26 = smov 256   ;;  %s34_s22 = int_to_ptr.vmem [resolvable:$true] %s33_s22 }
   0x5   :  { %s1185_s27 = smov 16   ;;  %s1186_s28 = smov [#allocation3]  }
   0x6   :  { %39 = dma.hbm_to_vmem [thread:$0]  %s32_s20, 4096, %s34_s22, [#allocation7], %s1184_s26, %s1184_s26, %s1185_s27  }
   0x7   :  { %s20_s29 = sshll.u32 %s1186_s28, 4  ;;  %s1187_s30 = smov 64   ;;  %s21_s29 = int_to_ptr.vmem [resolvable:$true] %s20_s29 }
   0x8   :  { %s1188_s6 = smov 4   ;;  %s45_s8 = sshll.u32 %s1244_s2, 4  ;;  %s46_s8 = int_to_ptr.hbm [resolvable:$true] %s45_s8 }
   0x9   :  { %26 = dma.hbm_to_vmem [thread:$0]  %s19_s25, 128, %s21_s29, [#allocation4], %s1187_s30, %s1187_s30, %s1188_s6  }
   0xa   :  { %s1189_s9 = smov [#allocation8]   ;;  %s55_s12 = sshll.u32 %s1245_s3, 4  ;;  %s56_s12 = int_to_ptr.hbm [resolvable:$true] %s55_s12 }
   0xb   :  { %s47_s10 = sshll.u32 %s1189_s9, 4  ;;  %s1190_s13 = smov [#allocation9]   ;;  %s48_s10 = int_to_ptr.vmem [resolvable:$true] %s47_s10 }
   0xc   :  { %50 = dma.hbm_to_vmem [thread:$0]  %s46_s8, 64, %s48_s10, [#allocation7]  }
   0xd   :  { %s57_s14 = sshll.u32 %s1190_s13, 4  ;;  %s58_s14 = int_to_ptr.vmem [resolvable:$true] %s57_s14 }
   0xe   :  { %63 = dma.hbm_to_vmem [thread:$0]  %s56_s12, 4096, %s58_s14, [#allocation10], %s1187_s30, %s1187_s30, %s1188_s6  }
   0xf   :  { %1175 = dma.done.wait [#allocation4], 128  }
  0x10   :  { %1176 = vsyncadd [#allocation4], 4294967168 }
  0x11   :  { %1177 = dma.done.wait [#allocation7], 4160  }
  0x12   :  { %1178 = vsyncadd [#allocation7], 4294963136 }
  0x13   :  { %1179 = dma.done.wait [#allocation10], 4096  }
  0x14   :  { %1180 = vsyncadd [#allocation10], 4294963200  ;;  %v836_v0 = vld [vmem:[#allocation6 + $0xe0] sm:$0xf]  ;;  %v1009_v1 = vld [vmem:[#allocation6 + $0xec] sm:$0xf0] }
  0x15   :  { %v1007_v2 = vld [vmem:[#allocation6 + $0xe4] sm:$0xf]  ;;  %v837_v3 = vor.u32 %v1009_v1, %v836_v0  ;;  %v838_v4 = vld [vmem:[#allocation6 + $0xf0] sm:$0xf0]  ;;  %v844_v5 = vld [vmem:[#allocation6 + $0xe8] sm:$0xf] }
  0x16   :  { %v1010_v6 = vld [vmem:[#allocation6 + $0xf4] sm:$0xf0]  ;;  %v841_v7 = vor.u32 %v1007_v2, %v838_v4  ;;  %v1008_v9 = vld [vmem:[#allocation6 + $0xec] sm:$0xf]  ;;  %v846_v10 = vld [vmem:[#allocation6 + $0xf8] sm:$0xf0] }
  0x17   :  { %v845_v8 = vor.u32 %v1010_v6, %v844_v5  ;;  %v820_v11 = vld [vmem:[#allocation6 + $0xc0] sm:$0xf]  ;;  %298 = vmatpush.bf16.msra.mxu0 %v837_v3  ;;  %v849_v12 = vor.u32 %v1008_v9, %v846_v10  ;;  %v1005_v13 = vld [vmem:[#allocation6 + $0xcc] sm:$0xf0]  ;;  %v1003_v14 = vld [vmem:[#allocation6 + $0xc4] sm:$0xf] }
  0x18   :  { %v822_v15 = vld [vmem:[#allocation6 + $0xd0] sm:$0xf0]  ;;  %312 = vmatpush.bf16.msra.mxu1 %v841_v7  ;;  %v821_v16 = vor.u32 %v1005_v13, %v820_v11  ;;  %v828_v18 = vld [vmem:[#allocation6 + $0xc8] sm:$0xf]  ;;  %v1006_v19 = vld [vmem:[#allocation6 + $0xd4] sm:$0xf0] }
  0x19   :  { %326 = vmatpush.bf16.msra.mxu2 %v845_v8  ;;  %v825_v17 = vor.u32 %v1003_v14, %v822_v15  ;;  %v1004_v20 = vld [vmem:[#allocation6 + $0xcc] sm:$0xf]  ;;  %340 = vmatpush.bf16.msra.mxu3 %v849_v12  ;;  %v829_v21 = vor.u32 %v1006_v19, %v828_v18  ;;  %v830_v22 = vld [vmem:[#allocation6 + $0xd8] sm:$0xf0]  ;;  %v804_v23 = vld [vmem:[#allocation6 + $0xa0] sm:$0xf] }
  0x1a   :  { %v1001_v24 = vld [vmem:[#allocation6 + $0xac] sm:$0xf0]  ;;  %v833_v25 = vor.u32 %v1004_v20, %v830_v22  ;;  %v999_v26 = vld [vmem:[#allocation6 + $0xa4] sm:$0xf]  ;;  %v806_v27 = vld [vmem:[#allocation6 + $0xb0] sm:$0xf0] }
  0x1b   :  { %v812_v28 = vld [vmem:[#allocation6 + $0xa8] sm:$0xf]  ;;  %299 = vmatpush.bf16.msra.mxu0 %v821_v16  ;;  %v805_v29 = vor.u32 %v1001_v24, %v804_v23  ;;  %v1002_v30 = vld [vmem:[#allocation6 + $0xb4] sm:$0xf0]  ;;  %v1000_v31 = vld [vmem:[#allocation6 + $0xac] sm:$0xf]  ;;  %v809_v33 = vor.u32 %v999_v26, %v806_v27 }
  0x1c   :  { %v814_v32 = vld [vmem:[#allocation6 + $0xb8] sm:$0xf0]  ;;  %313 = vmatpush.bf16.msra.mxu1 %v825_v17  ;;  %v813_v34 = vor.u32 %v1002_v30, %v812_v28  ;;  %v788_v35 = vld [vmem:[#allocation6 + $0x80] sm:$0xf]  ;;  %v997_v36 = vld [vmem:[#allocation6 + $0x8c] sm:$0xf0] }
  0x1d   :  { %327 = vmatpush.bf16.msra.mxu2 %v829_v21  ;;  %v995_v37 = vld [vmem:[#allocation6 + $0x84] sm:$0xf]  ;;  %341 = vmatpush.bf16.msra.mxu3 %v833_v25  ;;  %v817_v38 = vor.u32 %v1000_v31, %v814_v32  ;;  %v790_v39 = vld [vmem:[#allocation6 + $0x90] sm:$0xf0]  ;;  %v796_v40 = vld [vmem:[#allocation6 + $0x88] sm:$0xf]  ;;  %v789_v44 = vor.u32 %v997_v36, %v788_v35 }
  0x1e   :  { %v998_v41 = vld [vmem:[#allocation6 + $0x94] sm:$0xf0]  ;;  %v996_v42 = vld [vmem:[#allocation6 + $0x8c] sm:$0xf]  ;;  %v798_v43 = vld [vmem:[#allocation6 + $0x98] sm:$0xf0]  ;;  %v793_v45 = vor.u32 %v995_v37, %v790_v39 }
  0x1f   :  { %300 = vmatpush.bf16.msra.mxu0 %v805_v29  ;;  %v797_v46 = vor.u32 %v998_v41, %v796_v40  ;;  %v772_v47 = vld [vmem:[#allocation6 + $0x60] sm:$0xf]  ;;  %v993_v48 = vld [vmem:[#allocation6 + $0x6c] sm:$0xf0]  ;;  %v991_v49 = vld [vmem:[#allocation6 + $0x64] sm:$0xf]  ;;  %v801_v50 = vor.u32 %v996_v42, %v798_v43 }
  0x20   :  { %314 = vmatpush.bf16.msra.mxu1 %v809_v33  ;;  %v774_v51 = vld [vmem:[#allocation6 + $0x70] sm:$0xf0]  ;;  %v780_v52 = vld [vmem:[#allocation6 + $0x68] sm:$0xf]  ;;  %v994_v53 = vld [vmem:[#allocation6 + $0x74] sm:$0xf0]  ;;  %v773_v56 = vor.u32 %v993_v48, %v772_v47 }
  0x21   :  { %328 = vmatpush.bf16.msra.mxu2 %v813_v34  ;;  %342 = vmatpush.bf16.msra.mxu3 %v817_v38  ;;  %v992_v54 = vld [vmem:[#allocation6 + $0x6c] sm:$0xf]  ;;  %v782_v55 = vld [vmem:[#allocation6 + $0x78] sm:$0xf0]  ;;  %v777_v57 = vor.u32 %v991_v49, %v774_v51  ;;  %v781_v58 = vor.u32 %v994_v53, %v780_v52  ;;  %v756_v59 = vld [vmem:[#allocation6 + $0x40] sm:$0xf] }
  0x22   :  { %v989_v60 = vld [vmem:[#allocation6 + $0x4c] sm:$0xf0]  ;;  %v987_v61 = vld [vmem:[#allocation6 + $0x44] sm:$0xf]  ;;  %v785_v62 = vor.u32 %v992_v54, %v782_v55  ;;  %v758_v63 = vld [vmem:[#allocation6 + $0x50] sm:$0xf0] }
  0x23   :  { %301 = vmatpush.bf16.msra.mxu0 %v789_v44  ;;  %v764_v0 = vld [vmem:[#allocation6 + $0x48] sm:$0xf]  ;;  %v990_v1 = vld [vmem:[#allocation6 + $0x54] sm:$0xf0]  ;;  %v988_v2 = vld [vmem:[#allocation6 + $0x4c] sm:$0xf]  ;;  %v757_v4 = vor.u32 %v989_v60, %v756_v59  ;;  %v761_v5 = vor.u32 %v987_v61, %v758_v63 }
  0x24   :  { %315 = vmatpush.bf16.msra.mxu1 %v793_v45  ;;  %v766_v3 = vld [vmem:[#allocation6 + $0x58] sm:$0xf0]  ;;  %v765_v6 = vor.u32 %v990_v1, %v764_v0  ;;  %v740_v7 = vld [vmem:[#allocation6 + $0x20] sm:$0xf]  ;;  %v985_v8 = vld [vmem:[#allocation6 + $0x2c] sm:$0xf0] }
  0x25   :  { %329 = vmatpush.bf16.msra.mxu2 %v797_v46  ;;  %343 = vmatpush.bf16.msra.mxu3 %v801_v50  ;;  %v983_v9 = vld [vmem:[#allocation6 + $0x24] sm:$0xf]  ;;  %v769_v10 = vor.u32 %v988_v2, %v766_v3  ;;  %v742_v11 = vld [vmem:[#allocation6 + $0x30] sm:$0xf0]  ;;  %v748_v12 = vld [vmem:[#allocation6 + $0x28] sm:$0xf]  ;;  %v741_v16 = vor.u32 %v985_v8, %v740_v7 }
  0x26   :  { %v986_v13 = vld [vmem:[#allocation6 + $0x34] sm:$0xf0]  ;;  %v984_v14 = vld [vmem:[#allocation6 + $0x2c] sm:$0xf]  ;;  %v750_v15 = vld [vmem:[#allocation6 + $0x38] sm:$0xf0]  ;;  %v745_v17 = vor.u32 %v983_v9, %v742_v11 }
  0x27   :  { %302 = vmatpush.bf16.msra.mxu0 %v773_v56  ;;  %v749_v18 = vor.u32 %v986_v13, %v748_v12  ;;  %v724_v19 = vld [vmem:[#allocation6] sm:$0xf]  ;;  %v981_v20 = vld [vmem:[#allocation6 + $0xc] sm:$0xf0]  ;;  %v979_v21 = vld [vmem:[#allocation6 + $0x4] sm:$0xf]  ;;  %v753_v22 = vor.u32 %v984_v14, %v750_v15 }
  0x28   :  { %316 = vmatpush.bf16.msra.mxu1 %v777_v57  ;;  %v726_v23 = vld [vmem:[#allocation6 + $0x10] sm:$0xf0]  ;;  %v732_v24 = vld [vmem:[#allocation6 + $0x8] sm:$0xf]  ;;  %v982_v25 = vld [vmem:[#allocation6 + $0x14] sm:$0xf0]  ;;  %v725_v28 = vor.u32 %v981_v20, %v724_v19 }
  0x29   :  { %330 = vmatpush.bf16.msra.mxu2 %v781_v58  ;;  %344 = vmatpush.bf16.msra.mxu3 %v785_v62  ;;  %v980_v26 = vld [vmem:[#allocation6 + $0xc] sm:$0xf]  ;;  %v734_v27 = vld [vmem:[#allocation6 + $0x18] sm:$0xf0]  ;;  %v729_v29 = vor.u32 %v979_v21, %v726_v23  ;;  %v733_v30 = vor.u32 %v982_v25, %v732_v24  ;;  %v1017_v36 = vld [vmem:[#allocation9 + $0x30] sm:$0xff]  ;;  %s1191_s15 = smov [#allocation11]  }
  0x2a   :  { %v737_v31 = vor.u32 %v980_v26, %v734_v27  ;;  %v1018_v32 = vld [vmem:[#allocation9 + $0x38] sm:$0xff]  ;;  %v1025_v38 = vld [vmem:[#allocation9 + $0x70] sm:$0xff]  ;;  %v1016_v40 = vld [vmem:[#allocation9 + $0x28] sm:$0xff]  ;;  %s701_s16 = sshll.u32 %s1191_s15, 4  ;;  %s703_s19 = sshll.u32 %s1247_s5, 4  ;;  %s702_s16 = int_to_ptr.vmem [resolvable:$true] %s701_s16  ;;  %s704_s19 = int_to_ptr.hbm [resolvable:$true] %s703_s19 }
  0x2b   :  { %303 = vmatpush.bf16.msra.mxu0 %v757_v4  ;;  %v978_v33 = vld [vmem:[#allocation3] sm:$0xff]  ;;  %v1024_v42 = vld [vmem:[#allocation9 + $0x68] sm:$0xff]  ;;  %v1015_v44 = vld [vmem:[#allocation9 + $0x20] sm:$0xff]  ;;  %s1193_s20 = smov 8  }
  0x2c   :  { %317 = vmatpush.bf16.msra.mxu1 %v761_v5  ;;  %v1026_v34 = vld [vmem:[#allocation9 + $0x78] sm:$0xff]  ;;  %v1033_v39 = vld [vmem:[#allocation9 + $0xb0] sm:$0xff]  ;;  %v1032_v43 = vld [vmem:[#allocation9 + $0xa8] sm:$0xff] }
  0x2d   :  { %331 = vmatpush.bf16.msra.mxu2 %v765_v6  ;;  %345 = vmatpush.bf16.msra.mxu3 %v769_v10  ;;  %v1034_v35 = vld [vmem:[#allocation9 + $0xb8] sm:$0xff]  ;;  %v1041_v41 = vld [vmem:[#allocation9 + $0xf0] sm:$0xff]  ;;  %v1040_v45 = vld [vmem:[#allocation9 + $0xe8] sm:$0xff] }
  0x2e   :  { %v1042_v37 = vld [vmem:[#allocation9 + $0xf8] sm:$0xff]  ;;  %v1023_v46 = vld [vmem:[#allocation9 + $0x60] sm:$0xff]  ;;  %v1013_v51 = vld [vmem:[#allocation9 + $0x10] sm:$0xff] }
  0x2f   :  { %304 = vmatpush.bf16.msra.mxu0 %v741_v16  ;;  %v1014_v47 = vld [vmem:[#allocation9 + $0x18] sm:$0xff]  ;;  %v1031_v49 = vld [vmem:[#allocation9 + $0xa0] sm:$0xff]  ;;  %v1021_v52 = vld [vmem:[#allocation9 + $0x50] sm:$0xff] }
  0x30   :  { %318 = vmatpush.bf16.msra.mxu1 %v745_v17  ;;  %v1022_v48 = vld [vmem:[#allocation9 + $0x58] sm:$0xff]  ;;  %v1039_v50 = vld [vmem:[#allocation9 + $0xe0] sm:$0xff]  ;;  %v1012_v55 = vld [vmem:[#allocation9 + $0x8] sm:$0xff] }
  0x31   :  { %332 = vmatpush.bf16.msra.mxu2 %v749_v18  ;;  %346 = vmatpush.bf16.msra.mxu3 %v753_v22  ;;  %v1030_v53 = vld [vmem:[#allocation9 + $0x98] sm:$0xff]  ;;  %v1020_v56 = vld [vmem:[#allocation9 + $0x48] sm:$0xff]  ;;  %v1029_v57 = vld [vmem:[#allocation9 + $0x90] sm:$0xff] }
  0x32   :  { %v1038_v54 = vld [vmem:[#allocation9 + $0xd8] sm:$0xff]  ;;  %v1037_v58 = vld [vmem:[#allocation9 + $0xd0] sm:$0xff]  ;;  %v1011_v59 = vld [vmem:[#allocation9] sm:$0xff] }
  0x33   :  { %305 = vmatpush.bf16.msra.mxu0 %v725_v28  ;;  %v1019_v60 = vld [vmem:[#allocation9 + $0x40] sm:$0xff]  ;;  %v1028_v61 = vld [vmem:[#allocation9 + $0x88] sm:$0xff]  ;;  %v122_v1 = vld [vmem:[#allocation8] sm:$0xf] }
  0x34   :  { %319 = vmatpush.bf16.msra.mxu1 %v729_v29  ;;  %v1036_v62 = vld [vmem:[#allocation9 + $0xc8] sm:$0xff]  ;;  %v1027_v63 = vld [vmem:[#allocation9 + $0x80] sm:$0xff]  ;;  %v124_v3 = vperm.slane %v122_v1, 0  ;;  %v125_v5 = vperm.slane %v122_v1, 1  ;;  %v126_v15 = vperm.slane %v122_v1, 2  ;;  %v127_v17 = vperm.slane %v122_v1, 3 }
  0x35   :  { %333 = vmatpush.bf16.msra.mxu2 %v733_v30  ;;  %347 = vmatpush.bf16.msra.mxu3 %v737_v31  ;;  %v1035_v0 = vld [vmem:[#allocation9 + $0xc0] sm:$0xff] }
  0x36   :  { %306 = vmatmul.bf16.vlgmr.msra.gmra.mxu0 %v978_v33 }
  0x37   :  { %624 = vmatpush.bf16.msrb.mxu0 %v1018_v32  ;;  %320 = vmatmul.bf16.vlgmr.msra.gmra.mxu1 %v978_v33 }
  0x38   :  { %638 = vmatpush.bf16.msrb.mxu1 %v1026_v34  ;;  %334 = vmatmul.bf16.vlgmr.msra.gmra.mxu2 %v978_v33 }
  0x39   :  { %348 = vmatmul.bf16.vlgmr.msra.gmra.mxu3 %v978_v33  ;;  %652 = vmatpush.bf16.msrb.mxu2 %v1034_v35 }
  0x3a   :  { %666 = vmatpush.bf16.msrb.mxu3 %v1042_v37 }
  0x3b   :  { %625 = vmatpush.bf16.msrb.mxu0 %v1017_v36 }
  0x3c   :  { %639 = vmatpush.bf16.msrb.mxu1 %v1025_v38 }
  0x3d   :  { %653 = vmatpush.bf16.msrb.mxu2 %v1033_v39 }
  0x3e   :  { %667 = vmatpush.bf16.msrb.mxu3 %v1041_v41 }
  0x3f   :  { %626 = vmatpush.bf16.msrb.mxu0 %v1016_v40  ;;  %v1054_v40 = vld [vmem:[%s1246_s4] ss:$0 sm:$0xff]  ;;  %s1192_s4 = smov 128  }
  0x40   :  { %640 = vmatpush.bf16.msrb.mxu1 %v1024_v42 }
  0x41   :  { %654 = vmatpush.bf16.msrb.mxu2 %v1032_v43 }
  0x42   :  { %668 = vmatpush.bf16.msrb.mxu3 %v1040_v45 }
  0x43   :  { %627 = vmatpush.bf16.msrb.mxu0 %v1015_v44 }
  0x44   :  { %641 = vmatpush.bf16.msrb.mxu1 %v1023_v46 }
  0x45   :  { %655 = vmatpush.bf16.msrb.mxu2 %v1031_v49 }
  0x46   :  { %669 = vmatpush.bf16.msrb.mxu3 %v1039_v50 }
  0x47   :  { %628 = vmatpush.bf16.msrb.mxu0 %v1014_v47 }
  0x48   :  { %642 = vmatpush.bf16.msrb.mxu1 %v1022_v48 }
  0x49   :  { %656 = vmatpush.bf16.msrb.mxu2 %v1030_v53 }
  0x4a   :  { %670 = vmatpush.bf16.msrb.mxu3 %v1038_v54 }
  0x4b   :  { %629 = vmatpush.bf16.msrb.mxu0 %v1013_v51 }
  0x4c   :  { %643 = vmatpush.bf16.msrb.mxu1 %v1021_v52 }
  0x4d   :  { %657 = vmatpush.bf16.msrb.mxu2 %v1029_v57 }
  0x4e   :  { %671 = vmatpush.bf16.msrb.mxu3 %v1037_v58 }
  0x4f   :  { %630 = vmatpush.bf16.msrb.mxu0 %v1012_v55 }
  0x50   :  { %644 = vmatpush.bf16.msrb.mxu1 %v1020_v56 }
  0x51   :  { %658 = vmatpush.bf16.msrb.mxu2 %v1028_v61 }
  0x52   :  { %672 = vmatpush.bf16.msrb.mxu3 %v1036_v62 }
  0x53   :  { %631 = vmatpush.bf16.msrb.mxu0 %v1011_v59 }
  0x54   :  { %645 = vmatpush.bf16.msrb.mxu1 %v1019_v60 }
  0x55   :  { %659 = vmatpush.bf16.msrb.mxu2 %v1027_v63 }
  0x56   :  { %673 = vmatpush.bf16.msrb.mxu3 %v1035_v0 }
  0xb3   :  { %v307_v2 = vpop.f32.mrf.mxu0 }
  0xb4   :  { %v321_v4 = vpop.f32.mrf.mxu1  ;;  %v308_v6 = vadd.f32 %v307_v2, %v124_v3 }
  0xb5   :  { %v322_v7 = vadd.f32 %v321_v4, %v125_v5 }
  0xb6   :  { %v354_v11 = vmax.f32 %v308_v6, 0.0 }
  0xb7   :  { %v355_v14 = vmax.f32 %v322_v7, 0.0 }
  0xbb   :  { %v335_v8 = vpop.f32.mrf.mxu2  ;;  %v309_v10 = vpop.f32.mrf.mxu0 }
  0xbc   :  { %v349_v9 = vpop.f32.mrf.mxu3  ;;  %v310_v12 = vadd.f32 %v309_v10, %v124_v3  ;;  %v323_v13 = vpop.f32.mrf.mxu1  ;;  %v336_v21 = vadd.f32 %v335_v8, %v126_v15 }
  0xbd   :  { %v324_v16 = vadd.f32 %v323_v13, %v125_v5  ;;  %v350_v23 = vadd.f32 %v349_v9, %v127_v17 }
  0xbe   :  { %v358_v18 = vmax.f32 %v310_v12, 0.0  ;;  %v356_v28 = vmax.f32 %v336_v21, 0.0 }
  0xbf   :  { %v359_v19 = vmax.f32 %v324_v16, 0.0  ;;  %v357_v30 = vmax.f32 %v350_v23, 0.0 }
  0xc0   :  { %v364_v20 = vpack.c.bf16 %v358_v18, %v354_v11 }
  0xc1   :  { %v365_v22 = vpack.c.bf16 %v359_v19, %v355_v14 }
  0xc2   :  { %632 = vmatmul.bf16.vlgmr.msrb.gmra.mxu0 %v364_v20 }
  0xc3   :  { %v337_v24 = vpop.f32.mrf.mxu2  ;;  %646 = vmatmul.bf16.vlgmr.msrb.gmra.mxu1 %v365_v22 }
  0xc4   :  { %v338_v25 = vadd.f32 %v337_v24, %v126_v15  ;;  %v351_v26 = vpop.f32.mrf.mxu3 }
  0xc5   :  { %v352_v27 = vadd.f32 %v351_v26, %v127_v17 }
  0xc6   :  { %v360_v29 = vmax.f32 %v338_v25, 0.0 }
  0xc7   :  { %v361_v31 = vmax.f32 %v352_v27, 0.0 }
  0xc8   :  { %v366_v32 = vpack.c.bf16 %v360_v29, %v356_v28 }
  0xc9   :  { %v367_v33 = vpack.c.bf16 %v361_v31, %v357_v30 }
  0xca   :  { %660 = vmatmul.bf16.vlgmr.msrb.gmra.mxu2 %v366_v32 }
  0xcb   :  { %674 = vmatmul.bf16.vlgmr.msrb.gmra.mxu3 %v367_v33 }
 0x13f   :  { %v633_v34 = vpop.f32.mrf.mxu0 }
 0x140   :  { %v647_v35 = vpop.f32.mrf.mxu1 }
 0x141   :  { %v648_v36 = vadd.f32 %v647_v35, %v633_v34 }
 0x147   :  { %v635_v42 = vpop.f32.mrf.mxu0 }
 0x148   :  { %v649_v43 = vpop.f32.mrf.mxu1 }
 0x149   :  { %v650_v45 = vadd.f32 %v649_v43, %v635_v42 }
 0x14d   :  { %v661_v37 = vpop.f32.mrf.mxu2 }
 0x14e   :  { %v662_v38 = vadd.f32 %v661_v37, %v648_v36  ;;  %v675_v39 = vpop.f32.mrf.mxu3 }
 0x150   :  { %v676_v41 = vadd.f32 %v675_v39, %v662_v38 }
 0x152   :  { %v693_v44 = vadd.f32 %v1054_v40, %v676_v41 }
 0x154   :  { %695 = vst [vmem:[#allocation11] sm:$0xff] %v693_v44 }
 0x155   :  { %v663_v46 = vpop.f32.mrf.mxu2 }
 0x156   :  { %v664_v47 = vadd.f32 %v663_v46, %v650_v45  ;;  %v677_v48 = vpop.f32.mrf.mxu3 }
 0x158   :  { %v678_v49 = vadd.f32 %v677_v48, %v664_v47 }
 0x15a   :  { %v694_v50 = vadd.f32 %v1054_v40, %v678_v49 }
 0x15c   :  { %696 = vst [vmem:[#allocation11 + $0x8] sm:$0xff] %v694_v50 }
 0x15d   :  { %709 = dma.vmem_to_hbm [thread:$0]  %s702_s16, 256, %s704_s19, [#allocation5], %s1192_s4, %s1192_s4, %s1193_s20  }
 0x15e   :  { %1181 = dma.done.wait [#allocation5], 256  }
 0x15f   :  { %1182 = vsyncadd [#allocation5], 4294967040 }
 0x160   :  { %714 = vsyncpa [#allocation4], 1 }
 0x161   :  { %715 = vsyncpa [#allocation7], 1 }
 0x162   :  { %716 = vsyncpa [#allocation10], 1 }
 0x163   :  { %717 = vsyncpa [#allocation5], 1 }

</bundles_post_ra>
